<compile_context>
chip_gen: v7x
topology: tpu7x:2x2x1
jax: 0.10.0
libtpu: 0.0.40
codegen_flags: <defaults>
</compile_context>

<pallas_src>
import functools

import jax
import jax.numpy as jnp
from jax import lax
from jax.experimental import pallas as pl
from jax.experimental.pallas import tpu as pltpu


# ----------------------------------------------------------------------------
# Generation-aware VMEM budgeting
# ----------------------------------------------------------------------------
def _vmem_budget():
    """Returns (tile_sizing_budget_bytes, vmem_limit_bytes) for this chip."""
    cap = 64 * 1024 * 1024                      # conservative fallback (v7x per-TC)
    try:
        info = pltpu.get_tpu_info()
        cap = int(getattr(info, "vmem_capacity_bytes", cap)) or cap
    except Exception:
        pass
    limit = min(cap, max(32 * 1024 * 1024, (cap * 3) // 4))   # scoped limit requested
    budget = int(limit * 0.70)                                # headroom for compiler scratch
    return budget, limit


# ----------------------------------------------------------------------------
# Linear: out = x @ Q^T   ((i, j, k) = (rows, dout, din) tiling, f32 scratch)
# ----------------------------------------------------------------------------
def _linear_kernel(x_ref, q_ref, o_ref, acc_ref, *, din, tk):
    k = pl.program_id(2)

    @pl.when(k == 0)
    def _init():
        acc_ref[...] = jnp.zeros_like(acc_ref)

    xv = x_ref[...]
    qv = q_ref[...]
    if din % tk != 0:
        # Ragged last K tile: zero the out-of-range din columns of BOTH
        # operands so the edge block's undefined data never reaches acc.
        col = lax.broadcasted_iota(jnp.int32, (1, tk), 1) + k * tk
        valid = col < din
        xv = jnp.where(valid, xv, 0)
        qv = jnp.where(valid, qv, 0)

    # Contract on din of both operands (x @ Q^T): feeds the MXU directly, no
    # wrapper-side transpose of Q and no per-step XLU transpose of a streamed
    # operand (verified pattern; same contraction as reference flash kernels).
    acc_ref[...] += lax.dot_general(
        xv, qv,
        dimension_numbers=(((1,), (1,)), ((), ())),
        preferred_element_type=jnp.float32,
    )

    @pl.when(k == pl.num_programs(2) - 1)
    def _fin():
        o_ref[...] = acc_ref[...].astype(o_ref.dtype)


def pallas_linear(x, q):
    """F.linear(x, q): (N, din) x (dout, din) -> (N, dout).  No HBM padding."""
    n, din = x.shape
    dout = q.shape[0]
    budget, limit = _vmem_budget()

    # din (K) tile: full when small, else a lane-dense 512 chunk.
    tk = din if din <= 512 else 512
    # dout tile: full when small, else 256 (full MXU column width on v6e/v7x;
    # also fine on v5e's 128-wide MXU).
    tn = dout if dout <= 256 else 256

    # Row tile: largest multiple of 8 whose double-buffered working set fits.
    def ws(tm):
        return 4 * (2 * tm * tk + 2 * tn * tk + 2 * tm * tn + tm * tn)

    tm = 2048
    while tm > 8 and ws(tm) > budget:
        tm //= 2
    if n <= tm:
        tm = n                       # full-dim row block, no ragged row tile

    grid = (pl.cdiv(n, tm), pl.cdiv(dout, tn), pl.cdiv(din, tk))

    return pl.pallas_call(
        functools.partial(_linear_kernel, din=din, tk=tk),
        out_shape=jax.ShapeDtypeStruct((n, dout), x.dtype),
        grid=grid,
        in_specs=[
            pl.BlockSpec((tm, tk), lambda i, j, k: (i, k)),
            pl.BlockSpec((tn, tk), lambda i, j, k: (j, k)),
        ],
        out_specs=pl.BlockSpec((tm, tn), lambda i, j, k: (i, j)),
        scratch_shapes=[pltpu.VMEM((tm, tn), jnp.float32)],
        compiler_params=pltpu.CompilerParams(
            dimension_semantics=("parallel", "parallel", "arbitrary"),
            vmem_limit_bytes=limit,
        ),
    )(x, q)


# ----------------------------------------------------------------------------
# Covariance + running-covariance EMA, fused:
#   rC_new = rC + momentum * (X^T X / n - rC)
# ----------------------------------------------------------------------------
def _row_valid(tk, k, n_rows):
    row = lax.broadcasted_iota(jnp.int32, (tk, 1), 0) + k * tk
    return row < n_rows


def _cov_finalize(acc_ref, rc_ref, out_ref, inv_n, momentum):
    c = acc_ref[...] * inv_n
    rc = rc_ref[...].astype(jnp.float32)
    out_ref[...] = (rc + momentum * (c - rc)).astype(out_ref.dtype)


def _cov_kernel_single(x_ref, rc_ref, out_ref, acc_ref, *,
                       n_rows, tk, inv_n, momentum):
    k = pl.program_id(0)

    @pl.when(k == 0)
    def _init():
        acc_ref[...] = jnp.zeros_like(acc_ref)

    xv = x_ref[...]
    if n_rows % tk != 0:
        # Ragged last row tile: zero invalid rows so they cannot corrupt acc.
        xv = jnp.where(_row_valid(tk, k, n_rows), xv, 0)

    # X^T X partial product: contract on the row axis of both operands.
    acc_ref[...] += lax.dot_general(
        xv, xv, dimension_numbers=(((0,), (0,)), ((), ())),
        preferred_element_type=jnp.float32)

    @pl.when(k == pl.num_programs(0) - 1)
    def _fin():
        _cov_finalize(acc_ref, rc_ref, out_ref, inv_n, momentum)


def _cov_kernel_tiled(xl_ref, xc_ref, rc_ref, out_ref, acc_ref, *,
                      n_rows, tk, inv_n, momentum):
    k = pl.program_id(1)

    @pl.when(k == 0)
    def _init():
        acc_ref[...] = jnp.zeros_like(acc_ref)

    xl = xl_ref[...]
    xc = xc_ref[...]
    if n_rows % tk != 0:
        valid = _row_valid(tk, k, n_rows)
        xl = jnp.where(valid, xl, 0)
        xc = jnp.where(valid, xc, 0)

    acc_ref[...] += lax.dot_general(
        xl, xc, dimension_numbers=(((0,), (0,)), ((), ())),
        preferred_element_type=jnp.float32)

    @pl.when(k == pl.num_programs(1) - 1)
    def _fin():
        _cov_finalize(acc_ref, rc_ref, out_ref, inv_n, momentum)


def pallas_cov_ema(x, rc, momentum):
    """rC + momentum * (X^T X / n - rC) in one streamed, fused Pallas pass."""
    n, din = x.shape
    budget, limit = _vmem_budget()
    inv_n = 1.0 / n

    # ---- Path 1: single resident (din, din) accumulator; X read exactly once.
    def ws1(tk):   # x dbuf + rc dbuf + out dbuf + f32 acc
        return 4 * (2 * tk * din + 5 * din * din)

    if ws1(8) <= budget:
        tk = 2048
        while tk > 8 and ws1(tk) > budget:
            tk //= 2
        if n <= tk:
            tk = n
        return pl.pallas_call(
            functools.partial(_cov_kernel_single, n_rows=n, tk=tk,
                              inv_n=inv_n, momentum=momentum),
            out_shape=jax.ShapeDtypeStruct((din, din), rc.dtype),
            grid=(pl.cdiv(n, tk),),
            in_specs=[
                pl.BlockSpec((tk, din), lambda k: (k, 0)),
                pl.BlockSpec((din, din), lambda k: (0, 0)),   # rC: DMA'd once
            ],
            out_specs=pl.BlockSpec((din, din), lambda k: (0, 0)),
            scratch_shapes=[pltpu.VMEM((din, din), jnp.float32)],
            compiler_params=pltpu.CompilerParams(
                dimension_semantics=("arbitrary",),
                vmem_limit_bytes=limit,
            ),
        )(x, rc)

    # ---- Path 2 (large din): tile C's columns.  j is a "parallel" axis so
    # both v7x TensorCores split the covariance pass; VMEM use is O(din * tj).
    tj = 256

    def ws2(tk):   # x-rows dbuf + x-cols dbuf + rc dbuf + out dbuf + acc
        return 4 * (2 * tk * din + 2 * tk * tj + 5 * din * tj)

    tk = 2048
    while tk > 8 and ws2(tk) > budget:
        tk //= 2
    if n <= tk:
        tk = n

    return pl.pallas_call(
        functools.partial(_cov_kernel_tiled, n_rows=n, tk=tk,
                          inv_n=inv_n, momentum=momentum),
        out_shape=jax.ShapeDtypeStruct((din, din), rc.dtype),
        grid=(pl.cdiv(din, tj), pl.cdiv(n, tk)),
        in_specs=[
            pl.BlockSpec((tk, din), lambda j, k: (k, 0)),   # full-width rows
            pl.BlockSpec((tk, tj), lambda j, k: (k, j)),    # column slab
            pl.BlockSpec((din, tj), lambda j, k: (0, j)),   # rC column slab
        ],
        out_specs=pl.BlockSpec((din, tj), lambda j, k: (0, j)),
        scratch_shapes=[pltpu.VMEM((din, tj), jnp.float32)],
        compiler_params=pltpu.CompilerParams(
            dimension_semantics=("parallel", "arbitrary"),
            vmem_limit_bytes=limit,
        ),
    )(x, x, rc)


# ----------------------------------------------------------------------------
# BatchPC module (parameters/buffers + forward)
# ----------------------------------------------------------------------------
def init_batch_pc(din, dout, dtype=jnp.float32):
    """Deterministic buffer init mirroring BatchPC.__init__."""
    pivot = jnp.linspace(0.0, 1.0, din, dtype=dtype).reshape(din, 1)
    rC = jnp.eye(din, dtype=dtype)
    Q = jnp.eye(dout, din, dtype=dtype)
    return {"pivot": pivot, "rC": rC, "Q": Q}


def batch_pc_forward(x, buffers, *, din, dout, momentum=0.1, training=False):
    """Functional equivalent of BatchPC.forward.  Returns (output, buffers)."""
    pivot, rC, Q = buffers["pivot"], buffers["rC"], buffers["Q"]

    if training:
        # Covariance + EMA fused into one streamed Pallas kernel.  Q depends
        # on the *updated* rC, so this pass cannot fuse with the projection.
        rC = pallas_cov_ema(x, rC, momentum)

        # TODO(synk): torch.eig is a general eig with unspecified eigenpair
        # ordering and has no Pallas/TPU equivalent; we use jnp.linalg.eigh in
        # plain JAX and select the LARGEST dout eigenpairs (principal
        # directions), so the selected pairs may differ from a torch.eig run.
        es, ev = jnp.linalg.eigh(rC)
        es = es[::-1][:dout].reshape(dout, 1)
        ev = ev[:, ::-1][:, :dout].T                     # (dout, din)
        es = jnp.maximum(es, 1e-12)                      # guard 1/sqrt(~0)
        pos = jnp.sign(ev @ pivot)                       # (dout, 1)
        pos = jnp.where(pos == 0, 1.0, pos)              # guard zero sign
        ev = pos * ev
        Q = (1.0 / jnp.sqrt(es)) * ev

    out = pallas_linear(x, Q)                            # F.linear on the MXU
    new_buffers = {"pivot": pivot, "rC": rC, "Q": Q}
    return out, new_buffers


# ----------------------------------------------------------------------------
if __name__ == "__main__":
    din, dout, n = 32, 16, 16
    key = jax.random.PRNGKey(0)
    x = jax.random.normal(key, (n, din), dtype=jnp.float32)

    buffers = init_batch_pc(din, dout)

    # eval-mode forward (module semantics: plain F.linear(x, Q))
    out, _ = batch_pc_forward(x, buffers, din=din, dout=dout, training=False)
    out = jax.block_until_ready(out)

    # Tolerances accommodate reduced-precision f32 MXU passes in either the
    # kernel or the XLA reference; structural/tiling bugs still blow past them.
    ref = x @ buffers["Q"].T
    assert out.shape == (n, dout)
    assert jnp.allclose(out, ref, atol=2e-2, rtol=2e-2)

    # training branch: fused covariance+EMA kernel + eig glue + projection
    out_tr, new_buffers = batch_pc_forward(
        x, buffers, din=din, dout=dout, momentum=0.1, training=True
    )
    jax.block_until_ready(out_tr)
    jax.block_until_ready(new_buffers["rC"])

    C_ref = (x.T @ x) / n
    rC_ref = buffers["rC"] + 0.1 * (C_ref - buffers["rC"])
    assert jnp.allclose(new_buffers["rC"], rC_ref, atol=2e-2, rtol=2e-2)
    assert out_tr.shape == (n, dout)
    assert bool(jnp.all(jnp.isfinite(out_tr)))

    print("KERNEL_OK")
</pallas_src>

<mosaic_0001>
module attributes {stable_mosaic.version = 11 : i64} {
  func.func @_linear_kernel(%arg0: i32, %arg1: i32, %arg2: i32, %arg3: memref<16x32xf32, #tpu.memory_space<vmem>>, %arg4: memref<16x32xf32, #tpu.memory_space<vmem>>, %arg5: memref<16x16xf32, #tpu.memory_space<vmem>>, %arg6: memref<16x16xf32, #tpu.memory_space<vmem>>) attributes {dimension_semantics = [#tpu.dimension_semantics<parallel>, #tpu.dimension_semantics<parallel>, #tpu.dimension_semantics<arbitrary>], iteration_bounds = array<i64: 1, 1, 1>, scalar_prefetch = 0 : i64, scratch_operands = 1 : i64, tpu.core_type = #tpu.core_type<tc>, window_params = [{transform_indices = @transform_0, window_bounds = array<i64: 16, 32>}, {transform_indices = @transform_1, window_bounds = array<i64: 16, 32>}, {transform_indices = @transform_2, window_bounds = array<i64: 16, 16>}]} {
    %c0_i32 = arith.constant 0 : i32
    %0 = arith.cmpi eq, %arg2, %c0_i32 : i32
    %1 = arith.extui %0 : i1 to i32
    %c0_i32_0 = arith.constant 0 : i32
    %2 = arith.cmpi ne, %1, %c0_i32_0 : i32
    scf.if %2 {
      %cst_10 = arith.constant 0.000000e+00 : f32
      %12 = vector.broadcast %cst_10 : f32 to vector<16x16xf32>
      %c0_11 = arith.constant 0 : index
      %c0_12 = arith.constant 0 : index
      %13 = vector.load %arg6[%c0_11, %c0_12] : memref<16x16xf32, #tpu.memory_space<vmem>>, vector<16x16xf32>
      tpu.vector_store %arg6[%c0_11, %c0_12], %12 {strides = array<i32>} : memref<16x16xf32, #tpu.memory_space<vmem>>, vector<16x16xf32>,
    } else {
    }
    %c0 = arith.constant 0 : index
    %c0_1 = arith.constant 0 : index
    %3 = vector.load %arg3[%c0, %c0_1] : memref<16x32xf32, #tpu.memory_space<vmem>>, vector<16x32xf32>
    %c0_2 = arith.constant 0 : index
    %c0_3 = arith.constant 0 : index
    %4 = vector.load %arg4[%c0_2, %c0_3] : memref<16x32xf32, #tpu.memory_space<vmem>>, vector<16x32xf32>
    %c0_4 = arith.constant 0 : index
    %c0_5 = arith.constant 0 : index
    %5 = vector.load %arg6[%c0_4, %c0_5] : memref<16x16xf32, #tpu.memory_space<vmem>>, vector<16x16xf32>
    %cst = arith.constant dense<0.000000e+00> : vector<16x16xf32>
    %6 = tpu.matmul %3, %4, %cst {dimension_numbers = #tpu.dot_dimension_numbers<[1], [1], [0], [0], [0, 0, 1, 0], [], []>} : vector<16x32xf32>, vector<16x32xf32>, vector<16x16xf32> -> vector<16x16xf32>
    %7 = arith.addf %5, %6 : vector<16x16xf32>
    %c0_6 = arith.constant 0 : index
    %c0_7 = arith.constant 0 : index
    %8 = vector.load %arg6[%c0_6, %c0_7] : memref<16x16xf32, #tpu.memory_space<vmem>>, vector<16x16xf32>
    tpu.vector_store %arg6[%c0_6, %c0_7], %7 {strides = array<i32>} : memref<16x16xf32, #tpu.memory_space<vmem>>, vector<16x16xf32>,
    %c0_i32_8 = arith.constant 0 : i32
    %9 = arith.cmpi eq, %arg2, %c0_i32_8 : i32
    %10 = arith.extui %9 : i1 to i32
    %c0_i32_9 = arith.constant 0 : i32
    %11 = arith.cmpi ne, %10, %c0_i32_9 : i32
    scf.if %11 {
      %c0_10 = arith.constant 0 : index
      %c0_11 = arith.constant 0 : index
      %12 = vector.load %arg6[%c0_10, %c0_11] : memref<16x16xf32, #tpu.memory_space<vmem>>, vector<16x16xf32>
      %c0_12 = arith.constant 0 : index
      %c0_13 = arith.constant 0 : index
      %13 = vector.load %arg5[%c0_12, %c0_13] : memref<16x16xf32, #tpu.memory_space<vmem>>, vector<16x16xf32>
      tpu.vector_store %arg5[%c0_12, %c0_13], %12 {strides = array<i32>} : memref<16x16xf32, #tpu.memory_space<vmem>>, vector<16x16xf32>,
    } else {
    }
    return
  }
  func.func @transform_0(%arg0: i32, %arg1: i32, %arg2: i32) -> (i32, i32) {
    %c0_i32 = arith.constant 0 : i32
    return %arg0, %arg2 : i32, i32
  }
  func.func @transform_1(%arg0: i32, %arg1: i32, %arg2: i32) -> (i32, i32) {
    %c0_i32 = arith.constant 0 : i32
    return %arg1, %arg2 : i32, i32
  }
  func.func @transform_2(%arg0: i32, %arg1: i32, %arg2: i32) -> (i32, i32) {
    %c0_i32 = arith.constant 0 : i32
    return %arg0, %arg1 : i32, i32
  }
}

</mosaic_0001>

<bundles_post_ra>
// kernel: tpu_custom_call.1
= control target key start
LH: loop header
LB: loop body
LE: loop exit
PB: predicated region body
PF: predicated region fallthrough
CT: control target
= control target key end

     0   :  { %7 = vsyncpa [#allocation4], 0  ;;  %s342_s0 = inlined_call_operand.hbm [shape: f32[16,32], index: 0, kind: input, shape index: {}]   ;;  %s343_s1 = inlined_call_operand.hbm [shape: f32[16,32], index: 1, kind: input, shape index: {}]   ;;  %s344_s2 = inlined_call_operand.hbm [shape: f32[16,16], index: 2, kind: output, shape index: {}]  }
   0x1   :  { %8 = vsyncpa [#allocation7], 0 }
   0x2   :  { %9 = vsyncpa [#allocation5], 0  ;;  %s270_s9 = smov [#allocation3]   ;;  %s198_s13 = scalar_lea.hbm %s342_s0, 256 }
   0x3   :  { %s15_s10 = sshll.u32 %s270_s9, 4  ;;  %p199_p0 = scmp.ne.s32.totalorder %s342_s0, %s198_s13  ;;  %s16_s10 = int_to_ptr.vmem [resolvable:$true] %s15_s10 }
   0x4   :  { %p202_p1 = scmp.lt.u32.totalorder %s198_s13, %s342_s0 }
   0x6   :  { %p204_p2 = pnand %p202_p1, %p199_p0 }
   0x8   :  { %207 = shalt.err (!%p204_p2)
}
   0x9   :  { %s208_s18 = scalar_lea.vmem %s16_s10, 256  ;;  %p213_p4 = scmp.lt.s32.totalorder %s16_s10, %s16_s10 }
   0xa   :  { %p209_p3 = scmp.ne.s32.totalorder %s16_s10, %s208_s18  ;;  %p214_p5 = scmp.lt.s32.totalorder %s208_s18, %s208_s18 }
   0xc   :  { %p215_p6 = por %p214_p5, %p213_p4 }
   0xe   :  { %p216_p7 = pnand %p215_p6, %p209_p3 }
  0x10   :  { %219 = shalt.err (!%p216_p7)
}
  0x11   :  { %s271_s19 = smov 128   ;;  %s272_s20 = smov 8  }
  0x12   :  { %21 = dma.hbm_to_vmem [thread:$0]  %s342_s0, 256, %s16_s10, [#allocation4], %s271_s19, %s271_s19, %s272_s20  }
  0x13   :  { %s273_s23 = smov [#allocation6]   ;;  %s220_s27 = scalar_lea.hbm %s343_s1, 256 }
  0x14   :  { %s27_s24 = sshll.u32 %s273_s23, 4  ;;  %p221_p8 = scmp.ne.s32.totalorder %s343_s1, %s220_s27  ;;  %s28_s24 = int_to_ptr.vmem [resolvable:$true] %s27_s24 }
  0x15   :  { %p224_p9 = scmp.lt.u32.totalorder %s220_s27, %s343_s1 }
  0x17   :  { %p226_p10 = pnand %p224_p9, %p221_p8 }
  0x19   :  { %229 = shalt.err (!%p226_p10)
}
  0x1a   :  { %s230_s4 = scalar_lea.vmem %s28_s24, 256  ;;  %p235_p12 = scmp.lt.s32.totalorder %s28_s24, %s28_s24 }
  0x1b   :  { %p231_p11 = scmp.ne.s32.totalorder %s28_s24, %s230_s4  ;;  %p236_p13 = scmp.lt.s32.totalorder %s230_s4, %s230_s4 }
  0x1d   :  { %p237_p0 = por %p236_p13, %p235_p12 }
  0x1f   :  { %p238_p1 = pnand %p237_p0, %p231_p11 }
  0x21   :  { %241 = shalt.err (!%p238_p1)
}
  0x22   :  { %33 = dma.hbm_to_vmem [thread:$0]  %s343_s1, 256, %s28_s24, [#allocation7], %s271_s19, %s271_s19, %s272_s20  }
  0x23   :  { %264 = dma.done.wait [#allocation4], 256  }
  0x24   :  { %265 = vsyncadd [#allocation4], 4294967040 }
  0x25   :  { %266 = dma.done.wait [#allocation7], 256  }
  0x26   :  { %267 = vsyncadd [#allocation7], 4294967040  ;;  %vm44_vm0 = vcmask 130048   ;;  %v274_v0 = vmov 0.0   ;;  %vm53_vm1 = vcmask 261120   ;;  %v49_v1 = vld [vmem:[#allocation6] sm:$0xff] }
  0x27   :  { %46 = vst.msk [vmem:[#allocation2 + $0x8] sm:$0xff] %vm44_vm0, %v274_v0  ;;  %45 = vst.msk [vmem:[#allocation2] sm:$0xff] %vm44_vm0, %v274_v0  ;;  %v50_v2 = vld [vmem:[#allocation6 + $0x8] sm:$0xff]  ;;  %v47_v3 = vld [vmem:[#allocation3] sm:$0xff]  ;;  %s275_s1 = smov [#allocation8]  }
  0x28   :  { %vm187_vm2 = vmpackc.low %vm53_vm1, %vm53_vm1  ;;  %v186_v4 = vpack.c.bf16 %v50_v2, %v49_v1  ;;  %183 = vmatprep.mubr.msk.f32.mxu0 %vm53_vm1, %v47_v3  ;;  %v48_v5 = vld [vmem:[#allocation3 + $0x8] sm:$0xff]  ;;  %s158_s6 = sshll.u32 %s275_s1, 4  ;;  %s159_s6 = int_to_ptr.vmem [resolvable:$true] %s158_s6 }
  0x29   :  { %s242_s7 = scalar_lea.vmem %s159_s6, 256  ;;  %p247_p3 = scmp.lt.s32.totalorder %s159_s6, %s159_s6 }
  0x2a   :  { %188 = vmatprep.subr.msk.bf16.mxu0 %vm187_vm2, %v186_v4  ;;  %p243_p2 = scmp.ne.s32.totalorder %s159_s6, %s242_s7  ;;  %p248_p4 = scmp.lt.s32.totalorder %s242_s7, %s242_s7 }
  0x2b   :  { %191 = vmatpush3.bf16.xpose.msk.msra.mxu0 %vm187_vm2, %v186_v4 }
  0x2c   :  { %p249_p5 = por %p248_p4, %p247_p3 }
  0x2e   :  { %v52_v6 = vld [vmem:[#allocation2 + $0x8] sm:$0xff]  ;;  %v51_v7 = vld [vmem:[#allocation2] sm:$0xff]  ;;  %p250_p6 = pnand %p249_p5, %p243_p2 }
  0x32   :  { %184 = vmatmul.mubr.msk.f32.vlgmr.msra.gmra.mrb[0].mxu0 %vm53_vm1, %v48_v5 }
 0x105   :  { %v185_v8 = vpop.f32.mrb[0].mxu0 }
 0x106   :  { %v142_v9 = vadd.f32 %v185_v8, %v52_v6  ;;  %v132_v10 = vpop.f32.mrb[1].mxu0 }
 0x107   :  { %v141_v11 = vadd.f32 %v132_v10, %v51_v7 }
 0x108   :  { %145 = vst.msk [vmem:[#allocation2 + $0x8] sm:$0xff] %vm44_vm0, %v142_v9 }
 0x109   :  { %144 = vst.msk [vmem:[#allocation2] sm:$0xff] %vm44_vm0, %v141_v11 }
 0x10f   :  { %v150_v12 = vld [vmem:[#allocation2 + $0x8] sm:$0xff] }
 0x110   :  { %v149_v13 = vld [vmem:[#allocation2] sm:$0xff]  ;;  %152 = vst.msk [vmem:[#allocation8 + $0x8] sm:$0xff] %vm44_vm0, %v150_v12 }
 0x111   :  { %151 = vst.msk [vmem:[#allocation8] sm:$0xff] %vm44_vm0, %v149_v13 }
 0x112   :  { %253 = shalt.err (!%p250_p6)
}
 0x113   :  { %s254_s10 = scalar_lea.hbm %s344_s2, 256 }
 0x114   :  { %p255_p7 = scmp.ne.s32.totalorder %s344_s2, %s254_s10  ;;  %p258_p8 = scmp.lt.u32.totalorder %s254_s10, %s344_s2 }
 0x116   :  { %p260_p9 = pnand %p258_p8, %p255_p7 }
 0x118   :  { %263 = shalt.err (!%p260_p9)
}
 0x119   :  { %164 = dma.vmem_to_hbm [thread:$0]  %s159_s6, 256, %s344_s2, [#allocation5], %s271_s19, %s271_s19, %s272_s20  }
 0x11a   :  { %268 = dma.done.wait [#allocation5], 256  }
 0x11b   :  { %269 = vsyncadd [#allocation5], 4294967040 }
 0x11c   :  { %168 = vsyncpa [#allocation4], 1 }
 0x11d   :  { %169 = vsyncpa [#allocation7], 1 }
 0x11e   :  { %170 = vsyncpa [#allocation5], 1 }

</bundles_post_ra>
